<compile_context>
chip_gen: v5e
topology: v5e:2x2
jax: 0.10.0
libtpu: 0.0.40
codegen_flags: <defaults>
</compile_context>

<pallas_src>
import functools

import numpy as np
import jax
import jax.numpy as jnp
from jax.experimental import pallas as pl
from jax.experimental.pallas import tpu as pltpu


def transition_kernel(x_ref, sb_ref, w_ref, p_ref, out_ref):
    # x_ref  : (Nb, Cin, HW)       batch block, channels on sublanes, H*W on lanes
    # sb_ref : (Cin, 2)            folded BN scale (col 0) / shift (col 1), f32
    # w_ref  : (Cout, Cin)         1x1 conv weight, bf16
    # p_ref  : (HW, HW4)           2x2/stride-2 avg-pool matrix (0 / 0.25), bf16
    # out_ref: (1, Cout, Nb*HW4)   pooled outputs of the Nb elements packed on lanes
    nb, _, hw = x_ref.shape
    hw4 = p_ref.shape[1]

    scale = sb_ref[:, 0:1]                                   # (Cin, 1) f32
    shift = sb_ref[:, 1:2]                                   # (Cin, 1) f32

    # Fold the batch block onto the lane axis -> (Cin, Nb*HW).  Each slab is a
    # multiple of 128 lanes, so this is an aligned lane concatenation.
    x = jnp.concatenate([x_ref[b] for b in range(nb)], axis=-1)

    # BN (folded, inference form) + ReLU on the VPU; cast to bf16 for the MXU.
    y = jnp.maximum(x * scale + shift, 0.0).astype(jnp.bfloat16)   # (Cin, Nb*HW)

    # 1x1 conv: one wide MXU matmul, f32 accumulation.
    z = jnp.dot(w_ref[...], y, preferred_element_type=jnp.float32)  # (Cout, Nb*HW)
    zb = z.astype(jnp.bfloat16)

    # 2x2/stride-2 average pool as a matmul against P, per batch slice (keeps P
    # at (HW, HW4)).  Each pooled slab lands in its 128-lane-dense spot of the
    # output block, so the block writeback DMA is unmasked.
    for b in range(nb):
        pooled = jnp.dot(zb[:, b * hw:(b + 1) * hw], p_ref[...],
                         preferred_element_type=jnp.float32)         # (Cout, HW4)
        out_ref[0, :, b * hw4:(b + 1) * hw4] = pooled.astype(out_ref.dtype)


def _pool_matrix(H, W):
    """(HW, HW4) matrix with 0.25 where flat index p feeds pooled index q.

    Built host-side with numpy -> compile-time constant under jit.  Rows/cols
    that AvgPool2d(2) would drop (odd trailing H/W) are zeroed.
    """
    H2, W2 = H // 2, W // 2
    HW, HW4 = H * W, H2 * W2
    rows = np.arange(HW)
    hi, wi = rows // W, rows % W
    cols = (hi // 2) * W2 + (wi // 2)
    valid = (hi < 2 * H2) & (wi < 2 * W2)
    pool = (cols[:, None] == np.arange(HW4)[None, :]) & valid[:, None]
    # 0.25 is exactly representable in bf16.
    return jnp.asarray(pool.astype(np.float32) * 0.25, dtype=jnp.bfloat16)


def _pick_batch_block(n, cin, hw, budget_bytes=8 << 20):
    """Largest divisor of n whose x slab fits a modest VMEM budget."""
    per_elem = cin * hw * 4
    nb = max(1, min(n, budget_bytes // max(per_elem, 1)))
    while n % nb:
        nb -= 1
    return nb


@jax.jit
def transition_layer(x_nchw, params, eps=1e-5):
    """Pallas implementation of TransitionLayer.forward.  Input/output are NCHW."""
    gamma, beta, mean, var, wconv = params
    N, Cin, H, W = x_nchw.shape
    Cout = wconv.shape[0]
    H2, W2 = H // 2, W // 2
    HW, HW4 = H * W, H2 * W2

    Nb = _pick_batch_block(N, Cin, HW)
    NB = N // Nb

    # NCHW -> (N, Cin, H*W): free reshape, no transpose.  Keep the input dtype
    # (DMA the narrow dtype if upstream is bf16; promotion happens in-kernel).
    x_flat = x_nchw.reshape(N, Cin, HW)

    # Fold BN into per-channel scale/shift, merged into one (Cin, 2) operand.
    inv = gamma / jnp.sqrt(var + eps)
    sb = jnp.stack([inv, beta - mean * inv], axis=1).astype(jnp.float32)

    # 1x1 conv weight as a plain (Cout, Cin) bf16 matrix.
    wm = wconv[:, :, 0, 0].astype(jnp.bfloat16)

    pool = _pool_matrix(H, W)                                 # (HW, HW4) bf16 const

    # Grid-invariant operands: constant index_map -> single-buffer them.
    invariant = dict(pipeline_mode=pl.Buffered(1))

    out_packed = pl.pallas_call(
        transition_kernel,
        out_shape=jax.ShapeDtypeStruct((NB, Cout, Nb * HW4), jnp.float32),
        grid_spec=pltpu.PrefetchScalarGridSpec(
            num_scalar_prefetch=0,
            grid=(NB,),
            in_specs=[
                pl.BlockSpec((Nb, Cin, HW), lambda n: (n, 0, 0)),
                pl.BlockSpec((Cin, 2), lambda n: (0, 0), **invariant),
                pl.BlockSpec((Cout, Cin), lambda n: (0, 0), **invariant),
                pl.BlockSpec((HW, HW4), lambda n: (0, 0), **invariant),
            ],
            out_specs=pl.BlockSpec((1, Cout, Nb * HW4), lambda n: (n, 0, 0)),
        ),
        compiler_params=pltpu.CompilerParams(
            # Only shard across TensorCores when there is more than one grid
            # step; at NB=1 that would just duplicate invariant-operand DMAs.
            dimension_semantics=("parallel",) if NB > 1 else ("arbitrary",)),
    )(x_flat, sb, wm, pool)

    # Undo the lane packing on the tiny pooled output:
    # (NB, Cout, Nb*HW4) -> (NB, Cout, Nb, HW4) -> (N, Cout, H2, W2).
    out = out_packed.reshape(NB, Cout, Nb, HW4).transpose(0, 2, 1, 3)
    return out.reshape(N, Cout, H2, W2)


def transition_reference(x_nchw, params, eps=1e-5):
    """Pure-JAX reference (BN eval form -> ReLU -> 1x1 conv -> AvgPool2d(2))."""
    gamma, beta, mean, var, wconv = params
    inv = gamma / jnp.sqrt(var + eps)
    s = inv[None, :, None, None]
    b = (beta - mean * inv)[None, :, None, None]
    y = jnp.maximum(x_nchw.astype(jnp.float32) * s + b, 0.0)
    z = jnp.einsum('nchw,oc->nohw', y, wconv[:, :, 0, 0].astype(jnp.float32))
    N, Co, H, W = z.shape
    zc = z[:, :, :(H // 2) * 2, :(W // 2) * 2]
    zr = zc.reshape(N, Co, H // 2, 2, W // 2, 2)
    return zr.mean(axis=(3, 5))


def init_params(key, in_ch, out_ch):
    ks = jax.random.split(key, 5)
    gamma = jax.random.uniform(ks[0], (in_ch,), jnp.float32, 0.5, 1.5)
    beta = jax.random.normal(ks[1], (in_ch,), jnp.float32) * 0.1
    mean = jax.random.normal(ks[2], (in_ch,), jnp.float32) * 0.1
    var = jax.random.uniform(ks[3], (in_ch,), jnp.float32, 0.5, 1.5)
    wconv = jax.random.normal(ks[4], (out_ch, in_ch, 1, 1), jnp.float32) * 0.1
    return (gamma, beta, mean, var, wconv)


if __name__ == "__main__":
    # Small shapes consistent with the module: batch=2, in_ch=8, out_ch=4, 16x16.
    N, IN_CH, OUT_CH, H, W = 2, 8, 4, 16, 16

    key = jax.random.PRNGKey(0)
    k_x, k_p = jax.random.split(key)
    x = jax.random.normal(k_x, (N, IN_CH, H, W), jnp.float32)
    params = init_params(k_p, IN_CH, OUT_CH)

    out = transition_layer(x, params)
    out = jax.block_until_ready(out)

    ref = transition_reference(x, params)
    assert out.shape == (N, OUT_CH, H // 2, W // 2), out.shape
    # bf16 MXU operands (per perf review) -> tolerance loosened from 1e-4.
    assert jnp.allclose(out, ref, atol=3e-2, rtol=3e-2), \
        float(jnp.max(jnp.abs(out - ref)))

    print("KERNEL_OK")
</pallas_src>

<mosaic_0001>
module attributes {stable_mosaic.version = 11 : i64} {
  func.func @transition_kernel(%arg0: i32, %arg1: memref<2x8x256xf32, #tpu.memory_space<vmem>>, %arg2: memref<8x2xf32, #tpu.memory_space<vmem>>, %arg3: memref<4x8xbf16, #tpu.memory_space<vmem>>, %arg4: memref<256x64xbf16, #tpu.memory_space<vmem>>, %arg5: memref<1x4x128xf32, #tpu.memory_space<vmem>>) attributes {dimension_semantics = [#tpu.dimension_semantics<arbitrary>], iteration_bounds = array<i64: 1>, scalar_prefetch = 0 : i64, scratch_operands = 0 : i64, tpu.core_type = #tpu.core_type<tc>, window_params = [{transform_indices = @transform_0, window_bounds = array<i64: 2, 8, 256>}, {pipeline_mode = #tpu.pipeline_mode<synchronous>, transform_indices = @transform_1, window_bounds = array<i64: 8, 2>}, {pipeline_mode = #tpu.pipeline_mode<synchronous>, transform_indices = @transform_2, window_bounds = array<i64: 4, 8>}, {pipeline_mode = #tpu.pipeline_mode<synchronous>, transform_indices = @transform_3, window_bounds = array<i64: 256, 64>}, {transform_indices = @transform_4, window_bounds = array<i64: 1, 4, 128>}]} {
    %c0 = arith.constant 0 : index
    %c0_0 = arith.constant 0 : index
    %0 = vector.load %arg2[%c0, %c0_0] : memref<8x2xf32, #tpu.memory_space<vmem>>, vector<8x1xf32>
    %c0_1 = arith.constant 0 : index
    %c1 = arith.constant 1 : index
    %1 = vector.load %arg2[%c0_1, %c1] : memref<8x2xf32, #tpu.memory_space<vmem>>, vector<8x1xf32>
    %c0_2 = arith.constant 0 : index
    %c0_3 = arith.constant 0 : index
    %c0_4 = arith.constant 0 : index
    %2 = vector.load %arg1[%c0_2, %c0_3, %c0_4] : memref<2x8x256xf32, #tpu.memory_space<vmem>>, vector<1x8x256xf32>
    %3 = vector.shape_cast %2 : vector<1x8x256xf32> to vector<8x256xf32>
    %c1_5 = arith.constant 1 : index
    %c0_6 = arith.constant 0 : index
    %c0_7 = arith.constant 0 : index
    %4 = vector.load %arg1[%c1_5, %c0_6, %c0_7] : memref<2x8x256xf32, #tpu.memory_space<vmem>>, vector<1x8x256xf32>
    %5 = vector.shape_cast %4 : vector<1x8x256xf32> to vector<8x256xf32>
    %6 = tpu.concatenate %3, %5 in 1 : vector<8x256xf32>, vector<8x256xf32> -> vector<8x512xf32>
    %7 = vector.broadcast %0 : vector<8x1xf32> to vector<8x512xf32>
    %8 = arith.mulf %6, %7 : vector<8x512xf32>
    %9 = vector.broadcast %1 : vector<8x1xf32> to vector<8x512xf32>
    %10 = arith.addf %8, %9 : vector<8x512xf32>
    %cst = arith.constant 0.000000e+00 : f32
    %11 = vector.broadcast %cst : f32 to vector<8x512xf32>
    %12 = arith.maximumf %10, %11 : vector<8x512xf32>
    %13 = arith.truncf %12 : vector<8x512xf32> to vector<8x512xbf16>
    %c0_8 = arith.constant 0 : index
    %c0_9 = arith.constant 0 : index
    %14 = vector.load %arg3[%c0_8, %c0_9] : memref<4x8xbf16, #tpu.memory_space<vmem>>, vector<4x8xbf16>
    %cst_10 = arith.constant dense<0.000000e+00> : vector<4x512xf32>
    %15 = tpu.matmul %14, %13, %cst_10 {dimension_numbers = #tpu.dot_dimension_numbers<[1], [0], [0], [1], [0, 0, 1, 1], [], []>} : vector<4x8xbf16>, vector<8x512xbf16>, vector<4x512xf32> -> vector<4x512xf32>
    %16 = arith.truncf %15 : vector<4x512xf32> to vector<4x512xbf16>
    %17 = vector.extract_strided_slice %16 {offsets = [0, 0], sizes = [4, 256], strides = [1, 1]} : vector<4x512xbf16> to vector<4x256xbf16>
    %c0_11 = arith.constant 0 : index
    %c0_12 = arith.constant 0 : index
    %18 = vector.load %arg4[%c0_11, %c0_12] : memref<256x64xbf16, #tpu.memory_space<vmem>>, vector<256x64xbf16>
    %cst_13 = arith.constant dense<0.000000e+00> : vector<4x64xf32>
    %19 = tpu.matmul %17, %18, %cst_13 {dimension_numbers = #tpu.dot_dimension_numbers<[1], [0], [0], [1], [0, 0, 1, 1], [], []>} : vector<4x256xbf16>, vector<256x64xbf16>, vector<4x64xf32> -> vector<4x64xf32>
    %c0_14 = arith.constant 0 : index
    %c0_15 = arith.constant 0 : index
    %c0_16 = arith.constant 0 : index
    %20 = vector.load %arg5[%c0_14, %c0_15, %c0_16] : memref<1x4x128xf32, #tpu.memory_space<vmem>>, vector<1x4x64xf32>
    %21 = vector.shape_cast %20 : vector<1x4x64xf32> to vector<4x64xf32>
    %22 = vector.shape_cast %19 : vector<4x64xf32> to vector<1x4x64xf32>
    tpu.vector_store %arg5[%c0_14, %c0_15, %c0_16], %22 {strides = array<i32>} : memref<1x4x128xf32, #tpu.memory_space<vmem>>, vector<1x4x64xf32>,
    %23 = vector.extract_strided_slice %16 {offsets = [0, 256], sizes = [4, 256], strides = [1, 1]} : vector<4x512xbf16> to vector<4x256xbf16>
    %c0_17 = arith.constant 0 : index
    %c0_18 = arith.constant 0 : index
    %24 = vector.load %arg4[%c0_17, %c0_18] : memref<256x64xbf16, #tpu.memory_space<vmem>>, vector<256x64xbf16>
    %cst_19 = arith.constant dense<0.000000e+00> : vector<4x64xf32>
    %25 = tpu.matmul %23, %24, %cst_19 {dimension_numbers = #tpu.dot_dimension_numbers<[1], [0], [0], [1], [0, 0, 1, 1], [], []>} : vector<4x256xbf16>, vector<256x64xbf16>, vector<4x64xf32> -> vector<4x64xf32>
    %c0_20 = arith.constant 0 : index
    %c0_21 = arith.constant 0 : index
    %c64 = arith.constant 64 : index
    %26 = vector.load %arg5[%c0_20, %c0_21, %c64] : memref<1x4x128xf32, #tpu.memory_space<vmem>>, vector<1x4x64xf32>
    %27 = vector.shape_cast %26 : vector<1x4x64xf32> to vector<4x64xf32>
    %28 = vector.shape_cast %25 : vector<4x64xf32> to vector<1x4x64xf32>
    tpu.vector_store %arg5[%c0_20, %c0_21, %c64], %28 {strides = array<i32>} : memref<1x4x128xf32, #tpu.memory_space<vmem>>, vector<1x4x64xf32>,
    return
  }
  func.func @transform_0(%arg0: i32) -> (i32, i32, i32) {
    %c0_i32 = arith.constant 0 : i32
    %c0_i32_0 = arith.constant 0 : i32
    %c0_i32_1 = arith.constant 0 : i32
    return %arg0, %c0_i32, %c0_i32_0 : i32, i32, i32
  }
  func.func @transform_1(%arg0: i32) -> (i32, i32) {
    %c0_i32 = arith.constant 0 : i32
    %c0_i32_0 = arith.constant 0 : i32
    %c0_i32_1 = arith.constant 0 : i32
    return %c0_i32, %c0_i32_0 : i32, i32
  }
  func.func @transform_2(%arg0: i32) -> (i32, i32) {
    %c0_i32 = arith.constant 0 : i32
    %c0_i32_0 = arith.constant 0 : i32
    %c0_i32_1 = arith.constant 0 : i32
    return %c0_i32, %c0_i32_0 : i32, i32
  }
  func.func @transform_3(%arg0: i32) -> (i32, i32) {
    %c0_i32 = arith.constant 0 : i32
    %c0_i32_0 = arith.constant 0 : i32
    %c0_i32_1 = arith.constant 0 : i32
    return %c0_i32, %c0_i32_0 : i32, i32
  }
  func.func @transform_4(%arg0: i32) -> (i32, i32, i32) {
    %c0_i32 = arith.constant 0 : i32
    %c0_i32_0 = arith.constant 0 : i32
    %c0_i32_1 = arith.constant 0 : i32
    return %arg0, %c0_i32, %c0_i32_0 : i32, i32, i32
  }
}

</mosaic_0001>

<bundles_post_ra>
// kernel: transition_layer.1
= control target key start
LH: loop header
LB: loop body
LE: loop exit
PB: predicated region body
PF: predicated region fallthrough
CT: control target
= control target key end

     0   :  { %v626_v0 = vmov 0   ;;  %v627_v2 = vmov 1   ;;  %vm54_vm0 = vcmask 1043456   ;;  %vm50_vm1 = vcmask 64512   ;;  %s628_s6 = smov 64   ;;  %s774_s1 = inlined_call_operand.vmem [shape: f32[8,2], index: 1, kind: input, shape index: {}]   ;;  %s775_s0 = inlined_call_operand.vmem [shape: f32[2,8,256], index: 0, kind: input, shape index: {}]   ;;  %s776_s3 = inlined_call_operand.vmem [shape: bf16[256,64], index: 3, kind: input, shape index: {}]   ;;  %s777_s2 = inlined_call_operand.vmem [shape: bf16[4,8], index: 2, kind: input, shape index: {}]   ;;  %s778_s4 = inlined_call_operand.vmem [shape: f32[1,4,128], index: 4, kind: output, shape index: {}]  }
   0x1   :  { %624 = vset.pattern.permute.xlu0 %v626_v0  ;;  %v18_v1 = vld [vmem:[%s774_s1] sm:$0xff]  ;;  %v20_v5 = vld [vmem:[%s775_s0 + $0x8] sm:$0xff]  ;;  %v455_v6 = vld [vmem:[%s775_s0 + $0x10] sm:$0xff]  ;;  %vm282_vm2 = vcmask 519168   ;;  %vm449_vm3 = vcmask 1043968  }
   0x2   :  { %26 = vperm.xlu0 %624, %v18_v1   ;;  %v19_v4 = vld [vmem:[%s775_s0] sm:$0xff]  ;;  %v456_v7 = vld [vmem:[%s775_s0 + $0x18] sm:$0xff]  ;;  %v611_v32 = vld [vmem:[%s776_s3 + $0x30] sm:$0xff] }
   0x3   :  { %v612_v25 = vld [vmem:[%s776_s3 + $0x38] sm:$0xff]  ;;  %v49_v31 = vld [vmem:[%s777_s2] sm:$0x3]  ;;  %v619_v33 = vld [vmem:[%s776_s3 + $0x70] sm:$0xff] }
   0x4   :  { %v620_v26 = vld [vmem:[%s776_s3 + $0x78] sm:$0xff]  ;;  %v610_v34 = vld [vmem:[%s776_s3 + $0x28] sm:$0xff]  ;;  %v609_v36 = vld [vmem:[%s776_s3 + $0x20] sm:$0xff] }
   0x5   :  { %v618_v35 = vld [vmem:[%s776_s3 + $0x68] sm:$0xff]  ;;  %v617_v37 = vld [vmem:[%s776_s3 + $0x60] sm:$0xff]  ;;  %v608_v38 = vld [vmem:[%s776_s3 + $0x18] sm:$0xff] }
   0x6   :  { %v616_v39 = vld [vmem:[%s776_s3 + $0x58] sm:$0xff]  ;;  %v607_v40 = vld [vmem:[%s776_s3 + $0x10] sm:$0xff]  ;;  %v606_v42 = vld [vmem:[%s776_s3 + $0x8] sm:$0xff] }
   0x7   :  { %v615_v41 = vld [vmem:[%s776_s3 + $0x50] sm:$0xff]  ;;  %v614_v43 = vld [vmem:[%s776_s3 + $0x48] sm:$0xff]  ;;  %v605_v44 = vld [vmem:[%s776_s3] sm:$0xff] }
   0x8   :  { %v613_v45 = vld [vmem:[%s776_s3 + $0x40] sm:$0xff]  ;;  %v596_v46 = vld [vmem:[%s776_s3 + $0x38] sm:$0xff]  ;;  %v595_v48 = vld [vmem:[%s776_s3 + $0x30] sm:$0xff] }
   0x9   :  { %v604_v47 = vld [vmem:[%s776_s3 + $0x78] sm:$0xff]  ;;  %v603_v49 = vld [vmem:[%s776_s3 + $0x70] sm:$0xff]  ;;  %v594_v50 = vld [vmem:[%s776_s3 + $0x28] sm:$0xff] }
   0xa   :  { %625 = vset.pattern.permute.xlu0 %v627_v2  ;;  %v602_v51 = vld [vmem:[%s776_s3 + $0x68] sm:$0xff]  ;;  %v593_v52 = vld [vmem:[%s776_s3 + $0x20] sm:$0xff]  ;;  %v592_v54 = vld [vmem:[%s776_s3 + $0x18] sm:$0xff] }
   0xb   :  { %34 = vperm.xlu0 %625, %v18_v1   ;;  %v601_v53 = vld [vmem:[%s776_s3 + $0x60] sm:$0xff]  ;;  %v600_v55 = vld [vmem:[%s776_s3 + $0x58] sm:$0xff]  ;;  %v591_v58 = vld [vmem:[%s776_s3 + $0x10] sm:$0xff] }
   0xc   :  { %v599_v59 = vld [vmem:[%s776_s3 + $0x50] sm:$0xff]  ;;  %v590_v61 = vld [vmem:[%s776_s3 + $0x8] sm:$0xff] }
   0xd   :  { %v598_v62 = vld [vmem:[%s776_s3 + $0x48] sm:$0xff] }
  0x74   :  { %v27_v3 = vpop.permute.xlu0 %26 }
  0x75   :  { %v29_v8 = vmul.f32 %v27_v3, %v19_v4  ;;  %v30_v9 = vmul.f32 %v27_v3, %v20_v5  ;;  %v31_v10 = vmul.f32 %v455_v6, %v27_v3  ;;  %v32_v11 = vmul.f32 %v456_v7, %v27_v3  ;;  %v589_v6 = vld [vmem:[%s776_s3] sm:$0xff] }
  0x76   :  { %v597_v7 = vld [vmem:[%s776_s3 + $0x40] sm:$0xff] }
  0x7d   :  { %v35_v12 = vpop.permute.xlu0 %34 }
  0x7e   :  { %v37_v13 = vadd.f32 %v35_v12, %v29_v8  ;;  %v38_v14 = vadd.f32 %v35_v12, %v30_v9  ;;  %v39_v15 = vadd.f32 %v35_v12, %v31_v10  ;;  %v40_v16 = vadd.f32 %v35_v12, %v32_v11 }
  0x80   :  { %v41_v17 = vmax.f32 %v37_v13, 0.0  ;;  %v42_v18 = vmax.f32 %v38_v14, 0.0  ;;  %v43_v19 = vmax.f32 %v39_v15, 0.0  ;;  %v44_v20 = vmax.f32 %v40_v16, 0.0 }
  0x82   :  { %v45_v21 = vpack.c.bf16 %v41_v17, %v41_v17  ;;  %v46_v22 = vpack.c.bf16 %v42_v18, %v42_v18  ;;  %v47_v23 = vpack.c.bf16 %v43_v19, %v43_v19  ;;  %v48_v24 = vpack.c.bf16 %v44_v20, %v44_v20 }
  0x84   :  { %v56_v27 = vsel %vm54_vm0, %v45_v21, 0  ;;  %v59_v28 = vsel %vm54_vm0, %v46_v22, 0  ;;  %v62_v29 = vsel %vm54_vm0, %v47_v23, 0  ;;  %v65_v30 = vsel %vm54_vm0, %v48_v24, 0 }
  0x85   :  { %74 = vmatpush.bf16.msra.mxu0 %v56_v27  ;;  %87 = vmatpush.bf16.msra.mxu1 %v59_v28 }
  0x86   :  { %100 = vmatpush.bf16.msra.mxu2 %v62_v29  ;;  %113 = vmatpush.bf16.msra.mxu3 %v65_v30 }
  0x88   :  { %457 = vmatmul.msk.bf16.vlgmr.msra.gmra.mxu0 %vm50_vm1, %v49_v31  ;;  %458 = vmatmul.msk.bf16.vlgmr.msra.gmra.mxu1 %vm50_vm1, %v49_v31 }
  0x89   :  { %459 = vmatmul.msk.bf16.vlgmr.msra.gmra.mxu2 %vm50_vm1, %v49_v31  ;;  %460 = vmatmul.msk.bf16.vlgmr.msra.gmra.mxu3 %vm50_vm1, %v49_v31 }
  0x8a   :  { %419 = vmatpush.bf16.msrb.mxu2 %v612_v25  ;;  %432 = vmatpush.bf16.msrb.mxu3 %v620_v26 }
  0x8b   :  { %256 = vmatpush.bf16.msrb.mxu0 %v596_v46  ;;  %269 = vmatpush.bf16.msrb.mxu1 %v604_v47 }
  0x8e   :  { %420 = vmatpush.bf16.msrb.mxu2 %v611_v32  ;;  %433 = vmatpush.bf16.msrb.mxu3 %v619_v33 }
  0x8f   :  { %257 = vmatpush.bf16.msrb.mxu0 %v595_v48  ;;  %270 = vmatpush.bf16.msrb.mxu1 %v603_v49 }
  0x92   :  { %421 = vmatpush.bf16.msrb.mxu2 %v610_v34  ;;  %434 = vmatpush.bf16.msrb.mxu3 %v618_v35 }
  0x93   :  { %258 = vmatpush.bf16.msrb.mxu0 %v594_v50  ;;  %271 = vmatpush.bf16.msrb.mxu1 %v602_v51 }
  0x96   :  { %422 = vmatpush.bf16.msrb.mxu2 %v609_v36  ;;  %435 = vmatpush.bf16.msrb.mxu3 %v617_v37 }
  0x97   :  { %259 = vmatpush.bf16.msrb.mxu0 %v593_v52  ;;  %272 = vmatpush.bf16.msrb.mxu1 %v601_v53 }
  0x9a   :  { %423 = vmatpush.bf16.msrb.mxu2 %v608_v38  ;;  %436 = vmatpush.bf16.msrb.mxu3 %v616_v39 }
  0x9b   :  { %260 = vmatpush.bf16.msrb.mxu0 %v592_v54  ;;  %273 = vmatpush.bf16.msrb.mxu1 %v600_v55 }
  0x9e   :  { %424 = vmatpush.bf16.msrb.mxu2 %v607_v40  ;;  %437 = vmatpush.bf16.msrb.mxu3 %v615_v41 }
  0x9f   :  { %261 = vmatpush.bf16.msrb.mxu0 %v591_v58  ;;  %274 = vmatpush.bf16.msrb.mxu1 %v599_v59 }
  0xa2   :  { %425 = vmatpush.bf16.msrb.mxu2 %v606_v42  ;;  %438 = vmatpush.bf16.msrb.mxu3 %v614_v43 }
  0xa3   :  { %262 = vmatpush.bf16.msrb.mxu0 %v590_v61  ;;  %275 = vmatpush.bf16.msrb.mxu1 %v598_v62 }
  0xa6   :  { %426 = vmatpush.bf16.msrb.mxu2 %v605_v44  ;;  %439 = vmatpush.bf16.msrb.mxu3 %v613_v45 }
  0xa7   :  { %263 = vmatpush.bf16.msrb.mxu0 %v589_v6  ;;  %276 = vmatpush.bf16.msrb.mxu1 %v597_v7 }
 0x105   :  { %v76_v56 = vpop.f32.mrf.mxu0  ;;  %v89_v57 = vpop.f32.mrf.mxu1 }
 0x106   :  { %v119_v60 = vpack.c.bf16 %v89_v57, %v76_v56 }
 0x108   :  { %v154_v2 = vunpack.c.l.b16 %v119_v60  ;;  %v155_v3 = vunpack.c.h.b16 %v119_v60 }
 0x10a   :  { %v156_v12 = vpack.c.b16 %v154_v2, %v154_v2  ;;  %v157_v13 = vpack.c.b16 %v155_v3, %v155_v3 }
 0x10c   :  { %v102_v63 = vpop.f32.mrf.mxu2  ;;  %v115_v0 = vpop.f32.mrf.mxu3  ;;  %264 = vmatmul.bf16.vlgmr.msrb.gmra.mxu0 %v156_v12  ;;  %277 = vmatmul.bf16.vlgmr.msrb.gmra.mxu1 %v157_v13 }
 0x10d   :  { %v120_v1 = vpack.c.bf16 %v115_v0, %v102_v63  ;;  %v78_v4 = vpop.f32.mrf.mxu0  ;;  %v91_v5 = vpop.f32.mrf.mxu1 }
 0x10f   :  { %v317_v8 = vunpack.c.l.b16 %v120_v1  ;;  %v318_v9 = vunpack.c.h.b16 %v120_v1 }
 0x111   :  { %v319_v10 = vpack.c.b16 %v317_v8, %v317_v8  ;;  %v320_v11 = vpack.c.b16 %v318_v9, %v318_v9 }
 0x113   :  { %427 = vmatmul.bf16.vlgmr.msrb.gmra.mxu2 %v319_v10  ;;  %440 = vmatmul.bf16.vlgmr.msrb.gmra.mxu3 %v320_v11 }
 0x114   :  { %v104_v14 = vpop.f32.mrf.mxu2  ;;  %v117_v15 = vpop.f32.mrf.mxu3 }
 0x189   :  { %v265_v16 = vpop.f32.mrf.mxu0  ;;  %v278_v17 = vpop.f32.mrf.mxu1 }
 0x18a   :  { %v279_v18 = vadd.f32 %v278_v17, %v265_v16 }
 0x18c   :  { %283 = vst.msk [vmem:[%s778_s4] sm:$0xf] %vm282_vm2, %v279_v18 }
 0x191   :  { %v267_v22 = vpop.f32.mrf.mxu0  ;;  %v280_v23 = vpop.f32.mrf.mxu1 }
 0x196   :  { %v428_v19 = vpop.f32.mrf.mxu2  ;;  %v441_v20 = vpop.f32.mrf.mxu3 }
 0x197   :  { %v442_v21 = vadd.f32 %v441_v20, %v428_v19 }
 0x199   :  { %446 = vrot.lane.b32.xlu1 %v442_v21, %s628_s6 }
 0x19e   :  { %v430_v24 = vpop.f32.mrf.mxu2  ;;  %v443_v25 = vpop.f32.mrf.mxu3 }
 0x20b   :  { %v447_v26 = vpop.permute.xlu1 %446 }
 0x20c   :  { %450 = vst.msk [vmem:[%s778_s4] sm:$0xf] %vm449_vm3, %v447_v26 }

</bundles_post_ra>
